<compile_context>
chip_gen: v7x
topology: tpu7x:2x2x1
jax: 0.10.0
libtpu: 0.0.40
codegen_flags: <defaults>
</compile_context>

<pallas_src>
import math

import jax
import jax.numpy as jnp
from jax.experimental import pallas as pl
from jax.experimental.pallas import tpu as pltpu

IN_DIM = 1 * 28 * 28     # 784
HID_DIM = 480
HID_PAD = 512            # lane-dense hidden width
NUM_CLASSES = 10
OUT_PAD = 128            # lane-dense output width


def lenet_kernel(x_ref, w1_ref, b1_ref, w2_ref, b2_ref, o_ref):
    # x_ref:  (TB, 784)  f32      w1_ref: (784, 512) bf16   b1_ref: (1, 512) f32
    # w2_ref: (512, 128) bf16     b2_ref: (1, 128)  f32     o_ref:  (TB, 128)
    # Cast fused into the kernel (no standalone XLA convert pass / HBM round-trip).
    x = x_ref[...].astype(jnp.bfloat16)

    # fc1 + ReLU  (bf16 MXU inputs, f32 accumulation; elementwise in f32)
    h = jnp.dot(x, w1_ref[...], preferred_element_type=jnp.float32) + b1_ref[...]
    h = jnp.maximum(h, 0.0)

    # fc2 (bf16 MXU inputs again)
    logits = jnp.dot(h.astype(jnp.bfloat16), w2_ref[...],
                     preferred_element_type=jnp.float32) + b2_ref[...]

    # Masked, numerically-stable log_softmax over the first NUM_CLASSES lanes.
    # Mask is a single (1, OUT_PAD) row; broadcasting handles the (TB, 128) selects.
    col = jax.lax.broadcasted_iota(jnp.int32, (1, OUT_PAD), 1)
    valid = col < NUM_CLASSES
    masked_logits = jnp.where(valid, logits, -jnp.inf)
    m = jnp.max(masked_logits, axis=-1, keepdims=True)
    shifted = logits - m
    sum_exp = jnp.sum(jnp.where(valid, jnp.exp(shifted), 0.0),
                      axis=-1, keepdims=True)
    lse = jnp.log(sum_exp)
    o_ref[...] = jnp.where(valid, shifted - lse, 0.0).astype(o_ref.dtype)


def prepare_params(w1, b1, w2, b2):
    """Pad once at init time (480->512 hidden, 10->128 classes) and cast matmul
    operands to bf16 so no per-call pad/cast sits in front of the pallas_call."""
    w1p = jnp.zeros((IN_DIM, HID_PAD), jnp.bfloat16)
    w1p = w1p.at[:, :HID_DIM].set(w1.astype(jnp.bfloat16))
    b1p = jnp.zeros((1, HID_PAD), jnp.float32).at[:, :HID_DIM].set(b1)
    w2p = jnp.zeros((HID_PAD, OUT_PAD), jnp.bfloat16)
    w2p = w2p.at[:HID_DIM, :NUM_CLASSES].set(w2.astype(jnp.bfloat16))
    b2p = jnp.zeros((1, OUT_PAD), jnp.float32).at[:, :NUM_CLASSES].set(b2)
    return w1p, b1p, w2p, b2p


def lenet_forward(x_nchw, params, *, batch_tile=1024, out_dtype=jnp.float32):
    """x_nchw: (B, 1, 28, 28) -> (B, 10) log-probabilities.

    batch_tile: cap on rows per grid step (1024 default; 2048 fine for huge B).
    out_dtype:  jnp.float32 (default) or jnp.bfloat16 to halve output writeback
                on HBM-bound v6e.
    """
    w1p, b1p, w2p, b2p = params
    B = x_nchw.shape[0]
    x_flat = x_nchw.reshape(B, -1).astype(jnp.float32)   # torch.flatten(x, 1)

    # Tile: multiple of 16 rows (bf16 sublane packing).  For B >= 32 cap the
    # tile at half the padded batch so the grid has >= 2 steps and v7x's two
    # TensorCores both get work via the "parallel" batch axis.
    b16 = pl.cdiv(B, 16) * 16
    if b16 >= 32:
        tb = min(batch_tile, max(16, (b16 // 32) * 16))
    else:
        tb = b16
    b_pad = pl.cdiv(b16, tb) * tb
    if b_pad != B:
        x_flat = jnp.pad(x_flat, ((0, b_pad - B), (0, 0)))

    grid = (b_pad // tb,)

    flops = 2 * b_pad * (IN_DIM * HID_PAD + HID_PAD * OUT_PAD)
    out_bytes = b_pad * OUT_PAD * jnp.dtype(out_dtype).itemsize
    bytes_accessed = (x_flat.size * 4 + w1p.size * 2 + w2p.size * 2
                      + b1p.size * 4 + b2p.size * 4 + out_bytes)
    cost = pl.CostEstimate(flops=flops,
                           transcendentals=b_pad * OUT_PAD,
                           bytes_accessed=bytes_accessed)

    out_padded = pl.pallas_call(
        lenet_kernel,
        out_shape=jax.ShapeDtypeStruct((b_pad, OUT_PAD), out_dtype),
        grid=grid,
        in_specs=[
            pl.BlockSpec((tb, IN_DIM), lambda i: (i, 0)),       # x: tiled over batch
            pl.BlockSpec((IN_DIM, HID_PAD), lambda i: (0, 0)),  # w1: resident
            pl.BlockSpec((1, HID_PAD), lambda i: (0, 0)),       # b1: resident
            pl.BlockSpec((HID_PAD, OUT_PAD), lambda i: (0, 0)), # w2: resident
            pl.BlockSpec((1, OUT_PAD), lambda i: (0, 0)),       # b2: resident
        ],
        out_specs=pl.BlockSpec((tb, OUT_PAD), lambda i: (i, 0)),
        compiler_params=pltpu.CompilerParams(
            dimension_semantics=("parallel",)),                  # v7x: 2 TCs split batch
        cost_estimate=cost,
    )(x_flat, w1p, b1p, w2p, b2p)

    return out_padded[:B, :NUM_CLASSES]


def init_params(key):
    """Deterministic init mimicking nn.Linear default (uniform +/- 1/sqrt(fan_in))."""
    k1, k2, k3, k4 = jax.random.split(key, 4)
    bound1 = 1.0 / math.sqrt(IN_DIM)
    w1 = jax.random.uniform(k1, (IN_DIM, HID_DIM), jnp.float32, -bound1, bound1)
    b1 = jax.random.uniform(k2, (HID_DIM,), jnp.float32, -bound1, bound1)
    bound2 = 1.0 / math.sqrt(HID_DIM)
    w2 = jax.random.uniform(k3, (HID_DIM, NUM_CLASSES), jnp.float32, -bound2, bound2)
    b2 = jax.random.uniform(k4, (NUM_CLASSES,), jnp.float32, -bound2, bound2)
    return w1, b1, w2, b2


if __name__ == "__main__":
    key = jax.random.PRNGKey(0)
    pkey, xkey = jax.random.split(key)

    w1, b1, w2, b2 = init_params(pkey)
    params = prepare_params(w1, b1, w2, b2)

    # MNIST-like input: batch=2, NCHW (2, 1, 28, 28)
    x = jax.random.normal(xkey, (2, 1, 28, 28), dtype=jnp.float32)

    out = lenet_forward(x, params)
    out = jax.block_until_ready(out)

    # Reference in plain JAX with the same bf16-operand / f32-accumulate path.
    xf = x.reshape(x.shape[0], -1)
    h_ref = jnp.dot(xf.astype(jnp.bfloat16), w1.astype(jnp.bfloat16),
                    preferred_element_type=jnp.float32) + b1
    h_ref = jnp.maximum(h_ref, 0.0)
    logits_ref = jnp.dot(h_ref.astype(jnp.bfloat16), w2.astype(jnp.bfloat16),
                         preferred_element_type=jnp.float32) + b2
    ref = jax.nn.log_softmax(logits_ref, axis=1)

    assert out.shape == (2, NUM_CLASSES)
    assert jnp.allclose(out, ref, atol=2e-3, rtol=2e-3), float(
        jnp.max(jnp.abs(out - ref)))

    print("KERNEL_OK")
</pallas_src>

<mosaic_0001>
module attributes {stable_mosaic.version = 11 : i64} {
  func.func @lenet_kernel(%arg0: i32, %arg1: memref<16x784xf32, #tpu.memory_space<vmem>>, %arg2: memref<784x512xbf16, #tpu.memory_space<vmem>>, %arg3: memref<1x512xf32, #tpu.memory_space<vmem>>, %arg4: memref<512x128xbf16, #tpu.memory_space<vmem>>, %arg5: memref<1x128xf32, #tpu.memory_space<vmem>>, %arg6: memref<16x128xf32, #tpu.memory_space<vmem>>) attributes {dimension_semantics = [#tpu.dimension_semantics<parallel>], iteration_bounds = array<i64: 1>, scalar_prefetch = 0 : i64, scratch_operands = 0 : i64, tpu.core_type = #tpu.core_type<tc>, window_params = [{transform_indices = @transform_0, window_bounds = array<i64: 16, 784>}, {pipeline_mode = #tpu.pipeline_mode<synchronous>, transform_indices = @transform_1, window_bounds = array<i64: 784, 512>}, {pipeline_mode = #tpu.pipeline_mode<synchronous>, transform_indices = @transform_2, window_bounds = array<i64: 1, 512>}, {pipeline_mode = #tpu.pipeline_mode<synchronous>, transform_indices = @transform_3, window_bounds = array<i64: 512, 128>}, {pipeline_mode = #tpu.pipeline_mode<synchronous>, transform_indices = @transform_4, window_bounds = array<i64: 1, 128>}, {transform_indices = @transform_5, window_bounds = array<i64: 16, 128>}]} {
    %c0 = arith.constant 0 : index
    %c0_0 = arith.constant 0 : index
    %0 = vector.load %arg1[%c0, %c0_0] : memref<16x784xf32, #tpu.memory_space<vmem>>, vector<16x784xf32>
    %1 = arith.truncf %0 : vector<16x784xf32> to vector<16x784xbf16>
    %c0_1 = arith.constant 0 : index
    %c0_2 = arith.constant 0 : index
    %2 = vector.load %arg2[%c0_1, %c0_2] : memref<784x512xbf16, #tpu.memory_space<vmem>>, vector<784x512xbf16>
    %cst = arith.constant dense<0.000000e+00> : vector<16x512xf32>
    %3 = tpu.matmul %1, %2, %cst {dimension_numbers = #tpu.dot_dimension_numbers<[1], [0], [0], [1], [0, 0, 1, 1], [], []>} : vector<16x784xbf16>, vector<784x512xbf16>, vector<16x512xf32> -> vector<16x512xf32>
    %c0_3 = arith.constant 0 : index
    %c0_4 = arith.constant 0 : index
    %4 = vector.load %arg3[%c0_3, %c0_4] : memref<1x512xf32, #tpu.memory_space<vmem>>, vector<1x512xf32>
    %5 = vector.broadcast %4 : vector<1x512xf32> to vector<16x512xf32>
    %6 = arith.addf %3, %5 : vector<16x512xf32>
    %cst_5 = arith.constant 0.000000e+00 : f32
    %7 = vector.broadcast %cst_5 : f32 to vector<16x512xf32>
    %8 = arith.maximumf %6, %7 : vector<16x512xf32>
    %9 = arith.truncf %8 : vector<16x512xf32> to vector<16x512xbf16>
    %c0_6 = arith.constant 0 : index
    %c0_7 = arith.constant 0 : index
    %10 = vector.load %arg4[%c0_6, %c0_7] : memref<512x128xbf16, #tpu.memory_space<vmem>>, vector<512x128xbf16>
    %cst_8 = arith.constant dense<0.000000e+00> : vector<16x128xf32>
    %11 = tpu.matmul %9, %10, %cst_8 {dimension_numbers = #tpu.dot_dimension_numbers<[1], [0], [0], [1], [0, 0, 1, 1], [], []>} : vector<16x512xbf16>, vector<512x128xbf16>, vector<16x128xf32> -> vector<16x128xf32>
    %c0_9 = arith.constant 0 : index
    %c0_10 = arith.constant 0 : index
    %12 = vector.load %arg5[%c0_9, %c0_10] : memref<1x128xf32, #tpu.memory_space<vmem>>, vector<1x128xf32>
    %13 = vector.broadcast %12 : vector<1x128xf32> to vector<16x128xf32>
    %14 = arith.addf %11, %13 : vector<16x128xf32>
    %15 = tpu.iota {dimensions = array<i32: 1>} : vector<1x128xi32>
    %c10_i32 = arith.constant 10 : i32
    %16 = vector.broadcast %c10_i32 : i32 to vector<1x128xi32>
    %17 = arith.cmpi slt, %15, %16 : vector<1x128xi32>
    %cst_11 = arith.constant 0xFF800000 : f32
    %18 = vector.shape_cast %17 : vector<1x128xi1> to vector<1x128xi1>
    %19 = vector.broadcast %18 : vector<1x128xi1> to vector<16x128xi1>
    %20 = vector.broadcast %cst_11 : f32 to vector<16x128xf32>
    %21 = arith.select %19, %14, %20 : vector<16x128xi1>, vector<16x128xf32>
    %cst_12 = arith.constant dense<0xFF800000> : vector<16xf32>
    %22 = vector.multi_reduction <maximumf>, %21, %cst_12 [1] : vector<16x128xf32> to vector<16xf32>
    %23 = vector.shape_cast %22 : vector<16xf32> to vector<16x1xf32>
    %24 = vector.broadcast %23 : vector<16x1xf32> to vector<16x128xf32>
    %25 = arith.subf %14, %24 : vector<16x128xf32>
    %26 = math.exp %25 : vector<16x128xf32>
    %cst_13 = arith.constant 0.000000e+00 : f32
    %27 = vector.shape_cast %17 : vector<1x128xi1> to vector<1x128xi1>
    %28 = vector.broadcast %27 : vector<1x128xi1> to vector<16x128xi1>
    %29 = vector.broadcast %cst_13 : f32 to vector<16x128xf32>
    %30 = arith.select %28, %26, %29 : vector<16x128xi1>, vector<16x128xf32>
    %cst_14 = arith.constant dense<0.000000e+00> : vector<16xf32>
    %31 = vector.multi_reduction <add>, %30, %cst_14 [1] : vector<16x128xf32> to vector<16xf32>
    %32 = vector.shape_cast %31 : vector<16xf32> to vector<16x1xf32>
    %33 = math.log %32 : vector<16x1xf32>
    %34 = vector.broadcast %33 : vector<16x1xf32> to vector<16x128xf32>
    %35 = arith.subf %25, %34 : vector<16x128xf32>
    %cst_15 = arith.constant 0.000000e+00 : f32
    %36 = vector.shape_cast %17 : vector<1x128xi1> to vector<1x128xi1>
    %37 = vector.broadcast %36 : vector<1x128xi1> to vector<16x128xi1>
    %38 = vector.broadcast %cst_15 : f32 to vector<16x128xf32>
    %39 = arith.select %37, %35, %38 : vector<16x128xi1>, vector<16x128xf32>
    %c0_16 = arith.constant 0 : index
    %c0_17 = arith.constant 0 : index
    %40 = vector.load %arg6[%c0_16, %c0_17] : memref<16x128xf32, #tpu.memory_space<vmem>>, vector<16x128xf32>
    tpu.vector_store %arg6[%c0_16, %c0_17], %39 {strides = array<i32>} : memref<16x128xf32, #tpu.memory_space<vmem>>, vector<16x128xf32>,
    return
  }
  func.func @transform_0(%arg0: i32) -> (i32, i32) {
    %c0_i32 = arith.constant 0 : i32
    %c0_i32_0 = arith.constant 0 : i32
    return %arg0, %c0_i32 : i32, i32
  }
  func.func @transform_1(%arg0: i32) -> (i32, i32) {
    %c0_i32 = arith.constant 0 : i32
    %c0_i32_0 = arith.constant 0 : i32
    %c0_i32_1 = arith.constant 0 : i32
    return %c0_i32, %c0_i32_0 : i32, i32
  }
  func.func @transform_2(%arg0: i32) -> (i32, i32) {
    %c0_i32 = arith.constant 0 : i32
    %c0_i32_0 = arith.constant 0 : i32
    %c0_i32_1 = arith.constant 0 : i32
    return %c0_i32, %c0_i32_0 : i32, i32
  }
  func.func @transform_3(%arg0: i32) -> (i32, i32) {
    %c0_i32 = arith.constant 0 : i32
    %c0_i32_0 = arith.constant 0 : i32
    %c0_i32_1 = arith.constant 0 : i32
    return %c0_i32, %c0_i32_0 : i32, i32
  }
  func.func @transform_4(%arg0: i32) -> (i32, i32) {
    %c0_i32 = arith.constant 0 : i32
    %c0_i32_0 = arith.constant 0 : i32
    %c0_i32_1 = arith.constant 0 : i32
    return %c0_i32, %c0_i32_0 : i32, i32
  }
  func.func @transform_5(%arg0: i32) -> (i32, i32) {
    %c0_i32 = arith.constant 0 : i32
    %c0_i32_0 = arith.constant 0 : i32
    return %arg0, %c0_i32 : i32, i32
  }
}

</mosaic_0001>

<bundles_post_ra>
// kernel: tpu_custom_call.1
= control target key start
LH: loop header
LB: loop body
LE: loop exit
PB: predicated region body
PF: predicated region fallthrough
CT: control target
= control target key end

     0   :  { %10 = vsyncpa [#allocation3], 0  ;;  %s2889_s0 = inlined_call_operand.hbm [shape: f32[16,784], index: 0, kind: input, shape index: {}]   ;;  %s2890_s1 = inlined_call_operand.hbm [shape: bf16[784,512], index: 1, kind: input, shape index: {}]   ;;  %s2891_s2 = inlined_call_operand.vmem [shape: f32[1,512], index: 2, kind: input, shape index: {}]   ;;  %s2892_s3 = inlined_call_operand.hbm [shape: bf16[512,128], index: 3, kind: input, shape index: {}]   ;;  %s2893_s4 = inlined_call_operand.vmem [shape: f32[1,128], index: 4, kind: input, shape index: {}]   ;;  %s2894_s5 = inlined_call_operand.hbm [shape: f32[16,128], index: 5, kind: output, shape index: {}]  }
   0x1   :  { %11 = vsyncpa [#allocation6], 0 }
   0x2   :  { %12 = vsyncpa [#allocation4], 0  ;;  %s2786_s18 = smov [#allocation5]   ;;  %s2692_s22 = scalar_lea.hbm %s2890_s1, 25088 }
   0x3   :  { %s30_s19 = sshll.u32 %s2786_s18, 4  ;;  %p2693_p0 = scmp.ne.s32.totalorder %s2890_s1, %s2692_s22  ;;  %s31_s19 = int_to_ptr.vmem [resolvable:$true] %s30_s19 }
   0x4   :  { %p2696_p1 = scmp.lt.u32.totalorder %s2692_s22, %s2890_s1 }
   0x6   :  { %p2698_p2 = pnand %p2696_p1, %p2693_p0 }
   0x8   :  { %2701 = shalt.err (!%p2698_p2)
}
   0x9   :  { %s2702_s27 = scalar_lea.vmem %s31_s19, 25088  ;;  %p2707_p4 = scmp.lt.s32.totalorder %s31_s19, %s31_s19 }
   0xa   :  { %p2703_p3 = scmp.ne.s32.totalorder %s31_s19, %s2702_s27  ;;  %p2708_p5 = scmp.lt.s32.totalorder %s2702_s27, %s2702_s27 }
   0xc   :  { %p2709_p6 = por %p2708_p5, %p2707_p4 }
   0xe   :  { %p2710_p7 = pnand %p2709_p6, %p2703_p3 }
  0x10   :  { %2713 = shalt.err (!%p2710_p7)
}
  0x11   :  { %s2787_s28 = smov 256   ;;  %s2788_s29 = smov 16  }
  0x12   :  { %36 = dma.hbm_to_vmem [thread:$0]  %s2890_s1, 25088, %s31_s19, [#allocation6], %s2787_s28, %s2787_s28, %s2788_s29  }
  0x13   :  { %s2789_s7 = smov [#allocation2]   ;;  %s2714_s11 = scalar_lea.hbm %s2889_s0, 1792 }
  0x14   :  { %s18_s8 = sshll.u32 %s2789_s7, 4  ;;  %p2715_p8 = scmp.ne.s32.totalorder %s2889_s0, %s2714_s11  ;;  %s19_s8 = int_to_ptr.vmem [resolvable:$true] %s18_s8 }
  0x15   :  { %p2718_p9 = scmp.lt.u32.totalorder %s2714_s11, %s2889_s0 }
  0x17   :  { %p2720_p10 = pnand %p2718_p9, %p2715_p8 }
  0x19   :  { %2723 = shalt.err (!%p2720_p10)
}
  0x1a   :  { %s2724_s16 = scalar_lea.vmem %s19_s8, 1792  ;;  %p2729_p12 = scmp.lt.s32.totalorder %s19_s8, %s19_s8 }
  0x1b   :  { %p2725_p11 = scmp.ne.s32.totalorder %s19_s8, %s2724_s16  ;;  %p2730_p13 = scmp.lt.s32.totalorder %s2724_s16, %s2724_s16 }
  0x1d   :  { %p2731_p0 = por %p2730_p13, %p2729_p12 }
  0x1f   :  { %p2732_p1 = pnand %p2731_p0, %p2725_p11 }
  0x21   :  { %2735 = shalt.err (!%p2732_p1)
}
  0x22   :  { %s2790_s1 = smov 896   ;;  %s2791_s17 = smov 56  }
  0x23   :  { %24 = dma.hbm_to_vmem [thread:$0]  %s2889_s0, 1792, %s19_s8, [#allocation3], %s2790_s1, %s2790_s1, %s2791_s17  }
  0x24   :  { %s2792_s20 = smov [#allocation7]   ;;  %s2736_s24 = scalar_lea.hbm %s2892_s3, 4096 }
  0x25   :  { %s44_s21 = sshll.u32 %s2792_s20, 4  ;;  %p2737_p2 = scmp.ne.s32.totalorder %s2892_s3, %s2736_s24  ;;  %s45_s21 = int_to_ptr.vmem [resolvable:$true] %s44_s21 }
  0x26   :  { %p2740_p3 = scmp.lt.u32.totalorder %s2736_s24, %s2892_s3 }
  0x28   :  { %p2742_p4 = pnand %p2740_p3, %p2737_p2 }
  0x2a   :  { %2745 = shalt.err (!%p2742_p4)
}
  0x2b   :  { %s2746_s29 = scalar_lea.vmem %s45_s21, 4096  ;;  %p2751_p6 = scmp.lt.s32.totalorder %s45_s21, %s45_s21 }
  0x2c   :  { %p2747_p5 = scmp.ne.s32.totalorder %s45_s21, %s2746_s29  ;;  %p2752_p7 = scmp.lt.s32.totalorder %s2746_s29, %s2746_s29 }
  0x2e   :  { %p2753_p8 = por %p2752_p7, %p2751_p6 }
  0x30   :  { %p2754_p9 = pnand %p2753_p8, %p2747_p5 }
  0x32   :  { %2757 = shalt.err (!%p2754_p9)
}
  0x33   :  { %s2793_s0 = smov 64   ;;  %s2794_s30 = smov 4  }
  0x34   :  { %50 = dma.hbm_to_vmem [thread:$0]  %s2892_s3, 4096, %s45_s21, [#allocation6], %s2793_s0, %s2793_s0, %s2794_s30  }
  0x35   :  { %2780 = dma.done.wait [#allocation3], 1792  }
  0x36   :  { %2781 = vsyncadd [#allocation3], 4294965504 }
  0x37   :  { %2782 = dma.done.wait [#allocation6], 29184  }
  0x38   :  { %2783 = vsyncadd [#allocation6], 4294938112  ;;  %v2358_v0 = vld [vmem:[#allocation5 + $0x4] ss:$16 sps:$4 sm:$0xff]   ;;  %v2360_v1 = vld [vmem:[#allocation5 + $0xc] ss:$16 sps:$4 sm:$0xff]  }
  0x39   :  { %1286 = vmatprep.subr.bf16.mxu0 %v2358_v0  ;;  %v2362_v2 = vld [vmem:[#allocation5] ss:$16 sps:$4 sm:$0xff]   ;;  %v2363_v3 = vld [vmem:[#allocation5 + $0x8] ss:$16 sps:$4 sm:$0xff]   ;;  %1458 = vmatprep.subr.bf16.mxu1 %v2360_v1  ;;  %v2364_v4 = vld [vmem:[#allocation5 + $0x24] ss:$16 sps:$4 sm:$0xff]  }
  0x3a   :  { %1287 = vmatpush1.bf16.msra.mxu0 %v2362_v2  ;;  %1459 = vmatpush1.bf16.msra.mxu1 %v2363_v3  ;;  %v2366_v5 = vld [vmem:[#allocation5 + $0x2c] ss:$16 sps:$4 sm:$0xff]   ;;  %v2368_v6 = vld [vmem:[#allocation5 + $0x20] ss:$16 sps:$4 sm:$0xff]   ;;  %v2369_v7 = vld [vmem:[#allocation5 + $0x28] ss:$16 sps:$4 sm:$0xff]  }
  0x3b   :  { %1288 = vmatprep.subr.bf16.mxu0 %v2364_v4  ;;  %1460 = vmatprep.subr.bf16.mxu1 %v2366_v5  ;;  %v2370_v8 = vld [vmem:[#allocation5 + $0x44] ss:$16 sps:$4 sm:$0xff]   ;;  %v2372_v9 = vld [vmem:[#allocation5 + $0x4c] ss:$16 sps:$4 sm:$0xff]   ;;  %v2374_v10 = vld [vmem:[#allocation5 + $0x40] ss:$16 sps:$4 sm:$0xff]  }
  0x3c   :  { %v2375_v11 = vld [vmem:[#allocation5 + $0x48] ss:$16 sps:$4 sm:$0xff]   ;;  %v2376_v12 = vld [vmem:[#allocation5 + $0x64] ss:$16 sps:$4 sm:$0xff]   ;;  %v2378_v13 = vld [vmem:[#allocation5 + $0x6c] ss:$16 sps:$4 sm:$0xff]  }
  0x3d   :  { %v2380_v14 = vld [vmem:[#allocation5 + $0x60] ss:$16 sps:$4 sm:$0xff]   ;;  %v2381_v15 = vld [vmem:[#allocation5 + $0x68] ss:$16 sps:$4 sm:$0xff]   ;;  %v2382_v16 = vld [vmem:[#allocation5 + $0x84] ss:$16 sps:$4 sm:$0xff]  }
  0x3e   :  { %1289 = vmatpush1.bf16.msra.mxu0 %v2368_v6  ;;  %1461 = vmatpush1.bf16.msra.mxu1 %v2369_v7  ;;  %v2384_v17 = vld [vmem:[#allocation5 + $0x8c] ss:$16 sps:$4 sm:$0xff]   ;;  %v2386_v18 = vld [vmem:[#allocation5 + $0x80] ss:$16 sps:$4 sm:$0xff]   ;;  %v2387_v19 = vld [vmem:[#allocation5 + $0x88] ss:$16 sps:$4 sm:$0xff]  }
  0x3f   :  { %1290 = vmatprep.subr.bf16.mxu0 %v2370_v8  ;;  %1462 = vmatprep.subr.bf16.mxu1 %v2372_v9  ;;  %v2388_v20 = vld [vmem:[#allocation5 + $0xa4] ss:$16 sps:$4 sm:$0xff]   ;;  %v2390_v21 = vld [vmem:[#allocation5 + $0xac] ss:$16 sps:$4 sm:$0xff]   ;;  %v2392_v22 = vld [vmem:[#allocation5 + $0xa0] ss:$16 sps:$4 sm:$0xff]  }
  0x40   :  { %v2393_v23 = vld [vmem:[#allocation5 + $0xa8] ss:$16 sps:$4 sm:$0xff]   ;;  %v2394_v24 = vld [vmem:[#allocation5 + $0xc4] ss:$16 sps:$4 sm:$0xff]   ;;  %v2396_v25 = vld [vmem:[#allocation5 + $0xcc] ss:$16 sps:$4 sm:$0xff]  }
  0x41   :  { %v2398_v26 = vld [vmem:[#allocation5 + $0xc0] ss:$16 sps:$4 sm:$0xff]   ;;  %v2399_v27 = vld [vmem:[#allocation5 + $0xc8] ss:$16 sps:$4 sm:$0xff]   ;;  %v2400_v28 = vld [vmem:[#allocation5 + $0xe4] ss:$16 sps:$4 sm:$0xff]  }
  0x42   :  { %1291 = vmatpush1.bf16.msra.mxu0 %v2374_v10  ;;  %1463 = vmatpush1.bf16.msra.mxu1 %v2375_v11  ;;  %v2402_v29 = vld [vmem:[#allocation5 + $0xec] ss:$16 sps:$4 sm:$0xff]   ;;  %v2404_v30 = vld [vmem:[#allocation5 + $0xe0] ss:$16 sps:$4 sm:$0xff]   ;;  %v2405_v31 = vld [vmem:[#allocation5 + $0xe8] ss:$16 sps:$4 sm:$0xff]  }
  0x43   :  { %1292 = vmatprep.subr.bf16.mxu0 %v2376_v12  ;;  %1464 = vmatprep.subr.bf16.mxu1 %v2378_v13  ;;  %v2406_v32 = vld [vmem:[#allocation5 + $0x104] ss:$16 sps:$4 sm:$0xff]   ;;  %v2408_v33 = vld [vmem:[#allocation5 + $0x10c] ss:$16 sps:$4 sm:$0xff]   ;;  %v2410_v34 = vld [vmem:[#allocation5 + $0x100] ss:$16 sps:$4 sm:$0xff]  }
  0x44   :  { %v2411_v35 = vld [vmem:[#allocation5 + $0x108] ss:$16 sps:$4 sm:$0xff]   ;;  %v2412_v36 = vld [vmem:[#allocation5 + $0x124] ss:$16 sps:$4 sm:$0xff]   ;;  %v2414_v37 = vld [vmem:[#allocation5 + $0x12c] ss:$16 sps:$4 sm:$0xff]  }
  0x45   :  { %v2416_v38 = vld [vmem:[#allocation5 + $0x120] ss:$16 sps:$4 sm:$0xff]   ;;  %v2417_v39 = vld [vmem:[#allocation5 + $0x128] ss:$16 sps:$4 sm:$0xff]   ;;  %v2418_v40 = vld [vmem:[#allocation5 + $0x144] ss:$16 sps:$4 sm:$0xff]  }
  0x46   :  { %1293 = vmatpush1.bf16.msra.mxu0 %v2380_v14  ;;  %1465 = vmatpush1.bf16.msra.mxu1 %v2381_v15  ;;  %v2420_v41 = vld [vmem:[#allocation5 + $0x14c] ss:$16 sps:$4 sm:$0xff]   ;;  %v2422_v42 = vld [vmem:[#allocation5 + $0x140] ss:$16 sps:$4 sm:$0xff]   ;;  %v2423_v43 = vld [vmem:[#allocation5 + $0x148] ss:$16 sps:$4 sm:$0xff]  }
  0x47   :  { %1294 = vmatprep.subr.bf16.mxu0 %v2382_v16  ;;  %1466 = vmatprep.subr.bf16.mxu1 %v2384_v17  ;;  %v2424_v44 = vld [vmem:[#allocation5 + $0x164] ss:$16 sps:$4 sm:$0xff]   ;;  %v2426_v45 = vld [vmem:[#allocation5 + $0x16c] ss:$16 sps:$4 sm:$0xff]   ;;  %v2428_v48 = vld [vmem:[#allocation5 + $0x160] ss:$16 sps:$4 sm:$0xff]  }
  0x48   :  { %v64_v46 = vld [vmem:[#allocation2 + $0x8] sm:$0xff]  ;;  %v71_v47 = vld [vmem:[#allocation2 + $0x40] sm:$0xff]  ;;  %v70_v5 = vld [vmem:[#allocation2 + $0x38] sm:$0xff]  ;;  %vm1282_vm0 = vcmask 130048  }
  0x49   :  { %v2429_v49 = vld [vmem:[#allocation5 + $0x168] ss:$16 sps:$4 sm:$0xff]   ;;  %v78_v50 = vpack.c.bf16 %v71_v47, %v64_v46  ;;  %v2430_v51 = vld [vmem:[#allocation5 + $0x184] ss:$16 sps:$4 sm:$0xff]   ;;  %v2432_v52 = vld [vmem:[#allocation5 + $0x18c] ss:$16 sps:$4 sm:$0xff]  }
  0x4a   :  { %1295 = vmatpush1.bf16.msra.mxu0 %v2386_v18  ;;  %1467 = vmatpush1.bf16.msra.mxu1 %v2387_v19  ;;  %v2434_v53 = vld [vmem:[#allocation5 + $0x180] ss:$16 sps:$4 sm:$0xff]   ;;  %v2435_v54 = vld [vmem:[#allocation5 + $0x188] ss:$16 sps:$4 sm:$0xff]   ;;  %v2436_v55 = vld [vmem:[#allocation5 + $0x1a4] ss:$16 sps:$4 sm:$0xff]  }
  0x4b   :  { %1296 = vmatprep.subr.bf16.mxu0 %v2388_v20  ;;  %1468 = vmatprep.subr.bf16.mxu1 %v2390_v21  ;;  %v2438_v56 = vld [vmem:[#allocation5 + $0x1ac] ss:$16 sps:$4 sm:$0xff]   ;;  %v2440_v57 = vld [vmem:[#allocation5 + $0x1a0] ss:$16 sps:$4 sm:$0xff]   ;;  %v2441_v58 = vld [vmem:[#allocation5 + $0x1a8] ss:$16 sps:$4 sm:$0xff]  }
  0x4c   :  { %1318 = vmatprep.mubr.bf16.mxu0 %v78_v50  ;;  %1490 = vmatprep.mubr.bf16.mxu1 %v78_v50  ;;  %v2442_v59 = vld [vmem:[#allocation5 + $0x1c4] ss:$16 sps:$4 sm:$0xff]   ;;  %v2444_v60 = vld [vmem:[#allocation5 + $0x1cc] ss:$16 sps:$4 sm:$0xff]   ;;  %v2446_v61 = vld [vmem:[#allocation5 + $0x1c0] ss:$16 sps:$4 sm:$0xff]  }
  0x4d   :  { %v2447_v62 = vld [vmem:[#allocation5 + $0x1c8] ss:$16 sps:$4 sm:$0xff]   ;;  %v2448_v63 = vld [vmem:[#allocation5 + $0x1e4] ss:$16 sps:$4 sm:$0xff]   ;;  %v2450_v0 = vld [vmem:[#allocation5 + $0x1ec] ss:$16 sps:$4 sm:$0xff]  }
  0x4e   :  { %1297 = vmatpush1.bf16.msra.mxu0 %v2392_v22  ;;  %1469 = vmatpush1.bf16.msra.mxu1 %v2393_v23  ;;  %v2452_v1 = vld [vmem:[#allocation5 + $0x1e0] ss:$16 sps:$4 sm:$0xff]   ;;  %v2453_v2 = vld [vmem:[#allocation5 + $0x1e8] ss:$16 sps:$4 sm:$0xff]   ;;  %v2456_v3 = vld [vmem:[#allocation5 + $0x204] ss:$16 sps:$4 sm:$0xff]  }
  0x4f   :  { %1298 = vmatprep.subr.bf16.mxu0 %v2394_v24  ;;  %1470 = vmatprep.subr.bf16.mxu1 %v2396_v25  ;;  %v63_v4 = vld [vmem:[#allocation2] sm:$0xff]  ;;  %v2459_v6 = vld [vmem:[#allocation5 + $0x20c] ss:$16 sps:$4 sm:$0xff]   ;;  %v2457_v8 = vld [vmem:[#allocation5 + $0x208] ss:$16 sps:$4 sm:$0xff]  }
  0x50   :  { %v2454_v7 = vld [vmem:[#allocation5 + $0x200] ss:$16 sps:$4 sm:$0xff]   ;;  %v77_v9 = vpack.c.bf16 %v70_v5, %v63_v4  ;;  %v2462_v10 = vld [vmem:[#allocation5 + $0x224] ss:$16 sps:$4 sm:$0xff]   ;;  %v2465_v11 = vld [vmem:[#allocation5 + $0x22c] ss:$16 sps:$4 sm:$0xff]  }
  0x51   :  { %v2460_v12 = vld [vmem:[#allocation5 + $0x220] ss:$16 sps:$4 sm:$0xff]   ;;  %v2463_v13 = vld [vmem:[#allocation5 + $0x228] ss:$16 sps:$4 sm:$0xff]   ;;  %v2468_v14 = vld [vmem:[#allocation5 + $0x244] ss:$16 sps:$4 sm:$0xff]  }
  0x52   :  { %1299 = vmatpush1.bf16.msra.mxu0 %v2398_v26  ;;  %1471 = vmatpush1.bf16.msra.mxu1 %v2399_v27  ;;  %v2471_v15 = vld [vmem:[#allocation5 + $0x24c] ss:$16 sps:$4 sm:$0xff]   ;;  %v2466_v16 = vld [vmem:[#allocation5 + $0x240] ss:$16 sps:$4 sm:$0xff]   ;;  %v2469_v17 = vld [vmem:[#allocation5 + $0x248] ss:$16 sps:$4 sm:$0xff]  }
  0x53   :  { %1300 = vmatprep.subr.bf16.mxu0 %v2400_v28  ;;  %1472 = vmatprep.subr.bf16.mxu1 %v2402_v29  ;;  %v2474_v18 = vld [vmem:[#allocation5 + $0x264] ss:$16 sps:$4 sm:$0xff]   ;;  %v2477_v19 = vld [vmem:[#allocation5 + $0x26c] ss:$16 sps:$4 sm:$0xff]   ;;  %v2472_v20 = vld [vmem:[#allocation5 + $0x260] ss:$16 sps:$4 sm:$0xff]  }
  0x54   :  { %v2475_v21 = vld [vmem:[#allocation5 + $0x268] ss:$16 sps:$4 sm:$0xff]   ;;  %v2480_v22 = vld [vmem:[#allocation5 + $0x284] ss:$16 sps:$4 sm:$0xff]   ;;  %v2483_v23 = vld [vmem:[#allocation5 + $0x28c] ss:$16 sps:$4 sm:$0xff]  }
  0x55   :  { %v2478_v24 = vld [vmem:[#allocation5 + $0x280] ss:$16 sps:$4 sm:$0xff]   ;;  %v2481_v25 = vld [vmem:[#allocation5 + $0x288] ss:$16 sps:$4 sm:$0xff]   ;;  %v2486_v26 = vld [vmem:[#allocation5 + $0x2a4] ss:$16 sps:$4 sm:$0xff]  }
  0x56   :  { %1301 = vmatpush1.bf16.msra.mxu0 %v2404_v30  ;;  %1473 = vmatpush1.bf16.msra.mxu1 %v2405_v31  ;;  %v2489_v27 = vld [vmem:[#allocation5 + $0x2ac] ss:$16 sps:$4 sm:$0xff]   ;;  %v2484_v28 = vld [vmem:[#allocation5 + $0x2a0] ss:$16 sps:$4 sm:$0xff]   ;;  %v2487_v29 = vld [vmem:[#allocation5 + $0x2a8] ss:$16 sps:$4 sm:$0xff]  }
  0x57   :  { %1302 = vmatprep.subr.bf16.mxu0 %v2406_v32  ;;  %1474 = vmatprep.subr.bf16.mxu1 %v2408_v33  ;;  %v2492_v30 = vld [vmem:[#allocation5 + $0x2c4] ss:$16 sps:$4 sm:$0xff]   ;;  %v2495_v31 = vld [vmem:[#allocation5 + $0x2cc] ss:$16 sps:$4 sm:$0xff]   ;;  %v2508_v47 = vld [vmem:[#allocation5 + $0x320] ss:$16 sps:$4 sm:$0xff]  }
  0x58   :  { %v66_v32 = vld [vmem:[#allocation2 + $0x18] sm:$0xff]  ;;  %v73_v33 = vld [vmem:[#allocation2 + $0x50] sm:$0xff] }
  0x59   :  { %v2513_v46 = vld [vmem:[#allocation5 + $0x32c] ss:$16 sps:$4 sm:$0xff]   ;;  %v2541_v4 = vld [vmem:[#allocation5 + $0x3c8] ss:$16 sps:$4 sm:$0xff]   ;;  %v2546_v5 = vld [vmem:[#allocation5 + $0x3e4] ss:$16 sps:$4 sm:$0xff]  }
  0x5a   :  { %1303 = vmatpush1.bf16.msra.mxu0 %v2410_v34  ;;  %1475 = vmatpush1.bf16.msra.mxu1 %v2411_v35  ;;  %v2490_v34 = vld [vmem:[#allocation5 + $0x2c0] ss:$16 sps:$4 sm:$0xff]   ;;  %v2493_v35 = vld [vmem:[#allocation5 + $0x2c8] ss:$16 sps:$4 sm:$0xff]   ;;  %v2519_v50 = vld [vmem:[#allocation5 + $0x34c] ss:$16 sps:$4 sm:$0xff]  }
  0x5b   :  { %1304 = vmatprep.subr.bf16.mxu0 %v2412_v36  ;;  %1476 = vmatprep.subr.bf16.mxu1 %v2414_v37  ;;  %v80_v36 = vpack.c.bf16 %v73_v33, %v66_v32  ;;  %v2498_v37 = vld [vmem:[#allocation5 + $0x2e4] ss:$16 sps:$4 sm:$0xff]   ;;  %v2579_v32 = vld [vmem:[#allocation5 + $0x48c] ss:$16 sps:$4 sm:$0xff]   ;;  %v2574_v33 = vld [vmem:[#allocation5 + $0x480] ss:$16 sps:$4 sm:$0xff]  }
  0x5e   :  { %1305 = vmatpush1.bf16.msra.mxu0 %v2416_v38  ;;  %1477 = vmatpush1.bf16.msra.mxu1 %v2417_v39  ;;  %v2501_v38 = vld [vmem:[#allocation5 + $0x2ec] ss:$16 sps:$4 sm:$0xff]   ;;  %v2496_v39 = vld [vmem:[#allocation5 + $0x2e0] ss:$16 sps:$4 sm:$0xff]  }
  0x5f   :  { %1306 = vmatprep.subr.bf16.mxu0 %v2418_v40  ;;  %1478 = vmatprep.subr.bf16.mxu1 %v2420_v41  ;;  %v2499_v40 = vld [vmem:[#allocation5 + $0x2e8] ss:$16 sps:$4 sm:$0xff]   ;;  %v2504_v41 = vld [vmem:[#allocation5 + $0x304] ss:$16 sps:$4 sm:$0xff]  }
  0x62   :  { %1307 = vmatpush1.bf16.msra.mxu0 %v2422_v42  ;;  %1479 = vmatpush1.bf16.msra.mxu1 %v2423_v43  ;;  %v2507_v42 = vld [vmem:[#allocation5 + $0x30c] ss:$16 sps:$4 sm:$0xff]   ;;  %v2502_v43 = vld [vmem:[#allocation5 + $0x300] ss:$16 sps:$4 sm:$0xff]  }
  0x63   :  { %1308 = vmatprep.subr.bf16.mxu0 %v2424_v44  ;;  %1480 = vmatprep.subr.bf16.mxu1 %v2426_v45  ;;  %v2505_v44 = vld [vmem:[#allocation5 + $0x308] ss:$16 sps:$4 sm:$0xff]   ;;  %v2510_v45 = vld [vmem:[#allocation5 + $0x324] ss:$16 sps:$4 sm:$0xff]  }
  0x66   :  { %1309 = vmatpush1.bf16.msra.mxu0 %v2428_v48  ;;  %1481 = vmatpush1.bf16.msra.mxu1 %v2429_v49  ;;  %v2511_v48 = vld [vmem:[#allocation5 + $0x328] ss:$16 sps:$4 sm:$0xff]   ;;  %v2516_v49 = vld [vmem:[#allocation5 + $0x344] ss:$16 sps:$4 sm:$0xff]  }
  0x67   :  { %1310 = vmatprep.subr.bf16.mxu0 %v2430_v51  ;;  %1482 = vmatprep.subr.bf16.mxu1 %v2432_v52  ;;  %v2514_v51 = vld [vmem:[#allocation5 + $0x340] ss:$16 sps:$4 sm:$0xff]   ;;  %v2517_v52 = vld [vmem:[#allocation5 + $0x348] ss:$16 sps:$4 sm:$0xff]  }
  0x6a   :  { %1311 = vmatpush1.bf16.msra.mxu0 %v2434_v53  ;;  %1483 = vmatpush1.bf16.msra.mxu1 %v2435_v54  ;;  %v2522_v53 = vld [vmem:[#allocation5 + $0x364] ss:$16 sps:$4 sm:$0xff]   ;;  %v2525_v54 = vld [vmem:[#allocation5 + $0x36c] ss:$16 sps:$4 sm:$0xff]  }
  0x6b   :  { %1312 = vmatprep.subr.bf16.mxu0 %v2436_v55  ;;  %1484 = vmatprep.subr.bf16.mxu1 %v2438_v56  ;;  %v2520_v55 = vld [vmem:[#allocation5 + $0x360] ss:$16 sps:$4 sm:$0xff]   ;;  %v2523_v56 = vld [vmem:[#allocation5 + $0x368] ss:$16 sps:$4 sm:$0xff]  }
  0x6e   :  { %1313 = vmatpush1.bf16.msra.mxu0 %v2440_v57  ;;  %1485 = vmatpush1.bf16.msra.mxu1 %v2441_v58  ;;  %v2528_v57 = vld [vmem:[#allocation5 + $0x384] ss:$16 sps:$4 sm:$0xff]   ;;  %v2531_v58 = vld [vmem:[#allocation5 + $0x38c] ss:$16 sps:$4 sm:$0xff]  }
  0x6f   :  { %1314 = vmatprep.subr.bf16.mxu0 %v2442_v59  ;;  %1486 = vmatprep.subr.bf16.mxu1 %v2444_v60  ;;  %v2526_v59 = vld [vmem:[#allocation5 + $0x380] ss:$16 sps:$4 sm:$0xff]   ;;  %v2529_v60 = vld [vmem:[#allocation5 + $0x388] ss:$16 sps:$4 sm:$0xff]  }
  0x72   :  { %1315 = vmatpush1.bf16.msra.mxu0 %v2446_v61  ;;  %1487 = vmatpush1.bf16.msra.mxu1 %v2447_v62  ;;  %v2534_v61 = vld [vmem:[#allocation5 + $0x3a4] ss:$16 sps:$4 sm:$0xff]   ;;  %v2537_v62 = vld [vmem:[#allocation5 + $0x3ac] ss:$16 sps:$4 sm:$0xff]  }
  0x73   :  { %1316 = vmatprep.subr.bf16.mxu0 %v2448_v63  ;;  %1488 = vmatprep.subr.bf16.mxu1 %v2450_v0  ;;  %v2532_v63 = vld [vmem:[#allocation5 + $0x3a0] ss:$16 sps:$4 sm:$0xff]   ;;  %v2535_v0 = vld [vmem:[#allocation5 + $0x3a8] ss:$16 sps:$4 sm:$0xff]  }
  0x76   :  { %1317 = vmatpush1.bf16.msra.mxu0 %v2452_v1  ;;  %1489 = vmatpush1.bf16.msra.mxu1 %v2453_v2  ;;  %v2540_v1 = vld [vmem:[#allocation5 + $0x3c4] ss:$16 sps:$4 sm:$0xff]   ;;  %v2543_v2 = vld [vmem:[#allocation5 + $0x3cc] ss:$16 sps:$4 sm:$0xff]  }
  0x77   :  { %1329 = vmatprep.subr.bf16.mxu0 %v2456_v3  ;;  %1501 = vmatprep.subr.bf16.mxu1 %v2459_v6  ;;  %v2538_v3 = vld [vmem:[#allocation5 + $0x3c0] ss:$16 sps:$4 sm:$0xff]   ;;  %v2549_v6 = vld [vmem:[#allocation5 + $0x3ec] ss:$16 sps:$4 sm:$0xff]  }
  0x79   :  { %1319 = vmatmul.mubr.bf16.vlgmr.msra.gmra.mrb[0].mxu0 %v77_v9  ;;  %1491 = vmatmul.mubr.bf16.vlgmr.msra.gmra.mrb[0].mxu1 %v77_v9  ;;  %v2552_v9 = vld [vmem:[#allocation5 + $0x404] ss:$16 sps:$4 sm:$0xff]  }
  0x7a   :  { %1330 = vmatpush1.bf16.msra.mxu0 %v2454_v7  ;;  %1502 = vmatpush1.bf16.msra.mxu1 %v2457_v8  ;;  %v2544_v7 = vld [vmem:[#allocation5 + $0x3e0] ss:$16 sps:$4 sm:$0xff]   ;;  %v2547_v8 = vld [vmem:[#allocation5 + $0x3e8] ss:$16 sps:$4 sm:$0xff]  }
  0x7b   :  { %1331 = vmatprep.subr.bf16.mxu0 %v2462_v10  ;;  %1503 = vmatprep.subr.bf16.mxu1 %v2465_v11  ;;  %v65_v10 = vld [vmem:[#allocation2 + $0x10] sm:$0xff]  ;;  %v72_v11 = vld [vmem:[#allocation2 + $0x48] sm:$0xff] }
  0x7c   :  { %1361 = vmatprep.mubr.bf16.mxu0 %v80_v36  ;;  %1533 = vmatprep.mubr.bf16.mxu1 %v80_v36  ;;  %v2585_v36 = vld [vmem:[#allocation5 + $0x4ac] ss:$16 sps:$4 sm:$0xff]  }
  0x7e   :  { %1332 = vmatpush1.bf16.msra.mxu0 %v2460_v12  ;;  %1504 = vmatpush1.bf16.msra.mxu1 %v2463_v13  ;;  %v2555_v12 = vld [vmem:[#allocation5 + $0x40c] ss:$16 sps:$4 sm:$0xff]   ;;  %v2550_v13 = vld [vmem:[#allocation5 + $0x400] ss:$16 sps:$4 sm:$0xff]  }
  0x7f   :  { %1333 = vmatprep.subr.bf16.mxu0 %v2468_v14  ;;  %1505 = vmatprep.subr.bf16.mxu1 %v2471_v15  ;;  %v2553_v14 = vld [vmem:[#allocation5 + $0x408] ss:$16 sps:$4 sm:$0xff]   ;;  %v79_v15 = vpack.c.bf16 %v72_v11, %v65_v10  ;;  %v2642_v11 = vld [vmem:[#allocation5 + $0x5e4] ss:$16 sps:$4 sm:$0xff]  }
  0x80   :  { %v2637_v10 = vld [vmem:[#allocation5 + $0x5c8] ss:$16 sps:$4 sm:$0xff]  }
  0x82   :  { %1334 = vmatpush1.bf16.msra.mxu0 %v2466_v16  ;;  %1506 = vmatpush1.bf16.msra.mxu1 %v2469_v17  ;;  %v2558_v16 = vld [vmem:[#allocation5 + $0x424] ss:$16 sps:$4 sm:$0xff]   ;;  %v2561_v17 = vld [vmem:[#allocation5 + $0x42c] ss:$16 sps:$4 sm:$0xff]  }
  0x83   :  { %1335 = vmatprep.subr.bf16.mxu0 %v2474_v18  ;;  %1507 = vmatprep.subr.bf16.mxu1 %v2477_v19  ;;  %v68_v18 = vld [vmem:[#allocation2 + $0x28] sm:$0xff]  ;;  %v2556_v19 = vld [vmem:[#allocation5 + $0x420] ss:$16 sps:$4 sm:$0xff]  }
  0x86   :  { %1336 = vmatpush1.bf16.msra.mxu0 %v2472_v20  ;;  %1508 = vmatpush1.bf16.msra.mxu1 %v2475_v21  ;;  %v2559_v20 = vld [vmem:[#allocation5 + $0x428] ss:$16 sps:$4 sm:$0xff]   ;;  %v75_v21 = vld [vmem:[#allocation2 + $0x60] sm:$0xff] }
  0x87   :  { %1337 = vmatprep.subr.bf16.mxu0 %v2480_v22  ;;  %1509 = vmatprep.subr.bf16.mxu1 %v2483_v23  ;;  %v2564_v22 = vld [vmem:[#allocation5 + $0x444] ss:$16 sps:$4 sm:$0xff]   ;;  %v82_v23 = vpack.c.bf16 %v75_v21, %v68_v18  ;;  %v2651_v18 = vld [vmem:[#allocation5 + $0x60c] ss:$16 sps:$4 sm:$0xff]   ;;  %v2649_v21 = vld [vmem:[#allocation5 + $0x608] ss:$16 sps:$4 sm:$0xff]  }
  0x8a   :  { %1338 = vmatpush1.bf16.msra.mxu0 %v2478_v24  ;;  %1510 = vmatpush1.bf16.msra.mxu1 %v2481_v25  ;;  %v2567_v24 = vld [vmem:[#allocation5 + $0x44c] ss:$16 sps:$4 sm:$0xff]   ;;  %v2562_v25 = vld [vmem:[#allocation5 + $0x440] ss:$16 sps:$4 sm:$0xff]  }
  0x8b   :  { %1339 = vmatprep.subr.bf16.mxu0 %v2486_v26  ;;  %1511 = vmatprep.subr.bf16.mxu1 %v2489_v27  ;;  %v2565_v26 = vld [vmem:[#allocation5 + $0x448] ss:$16 sps:$4 sm:$0xff]   ;;  %v2570_v27 = vld [vmem:[#allocation5 + $0x464] ss:$16 sps:$4 sm:$0xff]  }
  0x8e   :  { %1340 = vmatpush1.bf16.msra.mxu0 %v2484_v28  ;;  %1512 = vmatpush1.bf16.msra.mxu1 %v2487_v29  ;;  %v2573_v28 = vld [vmem:[#allocation5 + $0x46c] ss:$16 sps:$4 sm:$0xff]   ;;  %v2568_v29 = vld [vmem:[#allocation5 + $0x460] ss:$16 sps:$4 sm:$0xff]  }
  0x8f   :  { %1341 = vmatprep.subr.bf16.mxu0 %v2492_v30  ;;  %1513 = vmatprep.subr.bf16.mxu1 %v2495_v31  ;;  %v2571_v30 = vld [vmem:[#allocation5 + $0x468] ss:$16 sps:$4 sm:$0xff]   ;;  %v2576_v31 = vld [vmem:[#allocation5 + $0x484] ss:$16 sps:$4 sm:$0xff]  }
  0x92   :  { %1342 = vmatpush1.bf16.msra.mxu0 %v2490_v34  ;;  %1514 = vmatpush1.bf16.msra.mxu1 %v2493_v35  ;;  %v2577_v34 = vld [vmem:[#allocation5 + $0x488] ss:$16 sps:$4 sm:$0xff]   ;;  %v2582_v35 = vld [vmem:[#allocation5 + $0x4a4] ss:$16 sps:$4 sm:$0xff]  }
  0x93   :  { %1343 = vmatprep.subr.bf16.mxu0 %v2498_v37  ;;  %1515 = vmatprep.subr.bf16.mxu1 %v2501_v38  ;;  %v2580_v37 = vld [vmem:[#allocation5 + $0x4a0] ss:$16 sps:$4 sm:$0xff]   ;;  %v2583_v38 = vld [vmem:[#allocation5 + $0x4a8] ss:$16 sps:$4 sm:$0xff]  }
  0x96   :  { %1344 = vmatpush1.bf16.msra.mxu0 %v2496_v39  ;;  %1516 = vmatpush1.bf16.msra.mxu1 %v2499_v40  ;;  %v2588_v39 = vld [vmem:[#allocation5 + $0x4c4] ss:$16 sps:$4 sm:$0xff]   ;;  %v2591_v40 = vld [vmem:[#allocation5 + $0x4cc] ss:$16 sps:$4 sm:$0xff]  }
  0x97   :  { %1345 = vmatprep.subr.bf16.mxu0 %v2504_v41  ;;  %1517 = vmatprep.subr.bf16.mxu1 %v2507_v42  ;;  %v2586_v41 = vld [vmem:[#allocation5 + $0x4c0] ss:$16 sps:$4 sm:$0xff]   ;;  %v2589_v42 = vld [vmem:[#allocation5 + $0x4c8] ss:$16 sps:$4 sm:$0xff]  }
  0x9a   :  { %1346 = vmatpush1.bf16.msra.mxu0 %v2502_v43  ;;  %1518 = vmatpush1.bf16.msra.mxu1 %v2505_v44  ;;  %v2594_v43 = vld [vmem:[#allocation5 + $0x4e4] ss:$16 sps:$4 sm:$0xff]   ;;  %v2597_v44 = vld [vmem:[#allocation5 + $0x4ec] ss:$16 sps:$4 sm:$0xff]  }
  0x9b   :  { %1347 = vmatprep.subr.bf16.mxu0 %v2510_v45  ;;  %1519 = vmatprep.subr.bf16.mxu1 %v2513_v46  ;;  %v2592_v45 = vld [vmem:[#allocation5 + $0x4e0] ss:$16 sps:$4 sm:$0xff]   ;;  %v2595_v46 = vld [vmem:[#allocation5 + $0x4e8] ss:$16 sps:$4 sm:$0xff]  }
  0x9e   :  { %1348 = vmatpush1.bf16.msra.mxu0 %v2508_v47  ;;  %1520 = vmatpush1.bf16.msra.mxu1 %v2511_v48  ;;  %v2600_v47 = vld [vmem:[#allocation5 + $0x504] ss:$16 sps:$4 sm:$0xff]   ;;  %v2603_v48 = vld [vmem:[#allocation5 + $0x50c] ss:$16 sps:$4 sm:$0xff]  }
  0x9f   :  { %1349 = vmatprep.subr.bf16.mxu0 %v2516_v49  ;;  %1521 = vmatprep.subr.bf16.mxu1 %v2519_v50  ;;  %v2598_v49 = vld [vmem:[#allocation5 + $0x500] ss:$16 sps:$4 sm:$0xff]   ;;  %v2601_v50 = vld [vmem:[#allocation5 + $0x508] ss:$16 sps:$4 sm:$0xff]  }
  0xa2   :  { %1350 = vmatpush1.bf16.msra.mxu0 %v2514_v51  ;;  %1522 = vmatpush1.bf16.msra.mxu1 %v2517_v52  ;;  %v2606_v51 = vld [vmem:[#allocation5 + $0x524] ss:$16 sps:$4 sm:$0xff]   ;;  %v2609_v52 = vld [vmem:[#allocation5 + $0x52c] ss:$16 sps:$4 sm:$0xff]  }
  0xa3   :  { %1351 = vmatprep.subr.bf16.mxu0 %v2522_v53  ;;  %1523 = vmatprep.subr.bf16.mxu1 %v2525_v54  ;;  %v2604_v53 = vld [vmem:[#allocation5 + $0x520] ss:$16 sps:$4 sm:$0xff]   ;;  %v2607_v54 = vld [vmem:[#allocation5 + $0x528] ss:$16 sps:$4 sm:$0xff]  }
  0xa6   :  { %1352 = vmatpush1.bf16.msra.mxu0 %v2520_v55  ;;  %1524 = vmatpush1.bf16.msra.mxu1 %v2523_v56  ;;  %v2612_v55 = vld [vmem:[#allocation5 + $0x544] ss:$16 sps:$4 sm:$0xff]   ;;  %v2615_v56 = vld [vmem:[#allocation5 + $0x54c] ss:$16 sps:$4 sm:$0xff]  }
  0xa7   :  { %1353 = vmatprep.subr.bf16.mxu0 %v2528_v57  ;;  %1525 = vmatprep.subr.bf16.mxu1 %v2531_v58  ;;  %v2610_v57 = vld [vmem:[#allocation5 + $0x540] ss:$16 sps:$4 sm:$0xff]   ;;  %v2613_v58 = vld [vmem:[#allocation5 + $0x548] ss:$16 sps:$4 sm:$0xff]  }
  0xaa   :  { %1354 = vmatpush1.bf16.msra.mxu0 %v2526_v59  ;;  %1526 = vmatpush1.bf16.msra.mxu1 %v2529_v60  ;;  %v2618_v59 = vld [vmem:[#allocation5 + $0x564] ss:$16 sps:$4 sm:$0xff]   ;;  %v2621_v60 = vld [vmem:[#allocation5 + $0x56c] ss:$16 sps:$4 sm:$0xff]  }
  0xab   :  { %1355 = vmatprep.subr.bf16.mxu0 %v2534_v61  ;;  %1527 = vmatprep.subr.bf16.mxu1 %v2537_v62  ;;  %v2616_v61 = vld [vmem:[#allocation5 + $0x560] ss:$16 sps:$4 sm:$0xff]   ;;  %v2619_v62 = vld [vmem:[#allocation5 + $0x568] ss:$16 sps:$4 sm:$0xff]  }
  0xae   :  { %1356 = vmatpush1.bf16.msra.mxu0 %v2532_v63  ;;  %1528 = vmatpush1.bf16.msra.mxu1 %v2535_v0  ;;  %v2624_v63 = vld [vmem:[#allocation5 + $0x584] ss:$16 sps:$4 sm:$0xff]   ;;  %v2627_v0 = vld [vmem:[#allocation5 + $0x58c] ss:$16 sps:$4 sm:$0xff]  }
  0xaf   :  { %1357 = vmatprep.subr.bf16.mxu0 %v2540_v1  ;;  %1529 = vmatprep.subr.bf16.mxu1 %v2543_v2  ;;  %v2622_v1 = vld [vmem:[#allocation5 + $0x580] ss:$16 sps:$4 sm:$0xff]   ;;  %v2625_v2 = vld [vmem:[#allocation5 + $0x588] ss:$16 sps:$4 sm:$0xff]  }
  0xb2   :  { %1358 = vmatpush1.bf16.msra.mxu0 %v2538_v3  ;;  %1530 = vmatpush1.bf16.msra.mxu1 %v2541_v4  ;;  %v2630_v3 = vld [vmem:[#allocation5 + $0x5a4] ss:$16 sps:$4 sm:$0xff]   ;;  %v2633_v4 = vld [vmem:[#allocation5 + $0x5ac] ss:$16 sps:$4 sm:$0xff]  }
  0xb3   :  { %1359 = vmatprep.subr.bf16.mxu0 %v2546_v5  ;;  %1531 = vmatprep.subr.bf16.mxu1 %v2549_v6  ;;  %v2628_v5 = vld [vmem:[#allocation5 + $0x5a0] ss:$16 sps:$4 sm:$0xff]   ;;  %v2631_v6 = vld [vmem:[#allocation5 + $0x5a8] ss:$16 sps:$4 sm:$0xff]  }
  0xb6   :  { %1360 = vmatpush1.bf16.msra.mxu0 %v2544_v7  ;;  %1532 = vmatpush1.bf16.msra.mxu1 %v2547_v8  ;;  %v2636_v7 = vld [vmem:[#allocation5 + $0x5c4] ss:$16 sps:$4 sm:$0xff]   ;;  %v2639_v8 = vld [vmem:[#allocation5 + $0x5cc] ss:$16 sps:$4 sm:$0xff]  }
  0xb7   :  { %1372 = vmatprep.subr.bf16.mxu0 %v2552_v9  ;;  %1544 = vmatprep.subr.bf16.mxu1 %v2555_v12  ;;  %v2634_v9 = vld [vmem:[#allocation5 + $0x5c0] ss:$16 sps:$4 sm:$0xff]   ;;  %v2645_v12 = vld [vmem:[#allocation5 + $0x5ec] ss:$16 sps:$4 sm:$0xff]  }
  0xb9   :  { %1362 = vmatmul.mubr.bf16.vlgmr.msra.gmra.mrb[0].mxu0 %v79_v15  ;;  %1534 = vmatmul.mubr.bf16.vlgmr.msra.gmra.mrb[0].mxu1 %v79_v15  ;;  %v67_v15 = vld [vmem:[#allocation2 + $0x20] sm:$0xff] }
  0xba   :  { %1373 = vmatpush1.bf16.msra.mxu0 %v2550_v13  ;;  %1545 = vmatpush1.bf16.msra.mxu1 %v2553_v14  ;;  %v2640_v13 = vld [vmem:[#allocation5 + $0x5e0] ss:$16 sps:$4 sm:$0xff]   ;;  %v2643_v14 = vld [vmem:[#allocation5 + $0x5e8] ss:$16 sps:$4 sm:$0xff]  }
  0xbb   :  { %1374 = vmatprep.subr.bf16.mxu0 %v2558_v16  ;;  %1546 = vmatprep.subr.bf16.mxu1 %v2561_v17  ;;  %v74_v16 = vld [vmem:[#allocation2 + $0x58] sm:$0xff]  ;;  %v2648_v17 = vld [vmem:[#allocation5 + $0x604] ss:$16 sps:$4 sm:$0xff]  }
  0xbc   :  { %1404 = vmatprep.mubr.bf16.mxu0 %v82_v23  ;;  %1576 = vmatprep.mubr.bf16.mxu1 %v82_v23  ;;  %v2653_v23 = vld [vmem:[#allocation7 + $0xc0] sm:$0xff]  }
  0xbe   :  { %1375 = vmatpush1.bf16.msra.mxu0 %v2556_v19  ;;  %1547 = vmatpush1.bf16.msra.mxu1 %v2559_v20  ;;  %v81_v19 = vpack.c.bf16 %v74_v16, %v67_v15  ;;  %v2646_v20 = vld [vmem:[#allocation5 + $0x600] ss:$16 sps:$4 sm:$0xff]  }
  0xbf   :  { %1376 = vmatprep.subr.bf16.mxu0 %v2564_v22  ;;  %1548 = vmatprep.subr.bf16.mxu1 %v2567_v24  ;;  %v2652_v22 = vld [vmem:[#allocation7 + $0x40] sm:$0xff]   ;;  %v2795_v24 = vmov 0  }
  0xc2   :  { %1377 = vmatpush1.bf16.msra.mxu0 %v2562_v25  ;;  %1549 = vmatpush1.bf16.msra.mxu1 %v2565_v26  ;;  %v69_v25 = vld [vmem:[#allocation2 + $0x30] sm:$0xff]  ;;  %v76_v26 = vld [vmem:[#allocation2 + $0x68] sm:$0xff] }
  0xc3   :  { %1378 = vmatprep.subr.bf16.mxu0 %v2570_v27  ;;  %1550 = vmatprep.subr.bf16.mxu1 %v2573_v28  ;;  %v83_v27 = vpack.c.bf16 %v76_v26, %v69_v25  ;;  %v2654_v28 = vld [vmem:[#allocation7] sm:$0xff]  }
  0xc6   :  { %1379 = vmatpush1.bf16.msra.mxu0 %v2568_v29  ;;  %1551 = vmatpush1.bf16.msra.mxu1 %v2571_v30  ;;  %v2655_v29 = vld [vmem:[#allocation7 + $0x80] sm:$0xff]   ;;  %v2656_v30 = vld [vmem:[#allocation7 + $0x48] sm:$0xff]  }
  0xc7   :  { %1380 = vmatprep.subr.bf16.mxu0 %v2576_v31  ;;  %1552 = vmatprep.subr.bf16.mxu1 %v2579_v32  ;;  %v2657_v31 = vld [vmem:[#allocation7 + $0xc8] sm:$0xff]  }
  0xc8   :  { %v2658_v32 = vld [vmem:[#allocation7 + $0x8] sm:$0xff]  }
  0xca   :  { %1381 = vmatpush1.bf16.msra.mxu0 %v2574_v33  ;;  %1553 = vmatpush1.bf16.msra.mxu1 %v2577_v34  ;;  %v2659_v33 = vld [vmem:[#allocation7 + $0x88] sm:$0xff]   ;;  %v2660_v34 = vld [vmem:[#allocation7 + $0x50] sm:$0xff]  }
  0xcb   :  { %1382 = vmatprep.subr.bf16.mxu0 %v2582_v35  ;;  %1554 = vmatprep.subr.bf16.mxu1 %v2585_v36  ;;  %v2661_v35 = vld [vmem:[#allocation7 + $0xd0] sm:$0xff]  }
  0xcc   :  { %v2662_v36 = vld [vmem:[#allocation7 + $0x10] sm:$0xff]  }
  0xce   :  { %1383 = vmatpush1.bf16.msra.mxu0 %v2580_v37  ;;  %1555 = vmatpush1.bf16.msra.mxu1 %v2583_v38  ;;  %v2663_v37 = vld [vmem:[#allocation7 + $0x90] sm:$0xff]   ;;  %v2664_v38 = vld [vmem:[#allocation7 + $0x58] sm:$0xff]  }
  0xcf   :  { %1384 = vmatprep.subr.bf16.mxu0 %v2588_v39  ;;  %1556 = vmatprep.subr.bf16.mxu1 %v2591_v40  ;;  %v2665_v39 = vld [vmem:[#allocation7 + $0xd8] sm:$0xff]  }
  0xd0   :  { %v2666_v40 = vld [vmem:[#allocation7 + $0x18] sm:$0xff]  }
  0xd2   :  { %1385 = vmatpush1.bf16.msra.mxu0 %v2586_v41  ;;  %1557 = vmatpush1.bf16.msra.mxu1 %v2589_v42  ;;  %v2667_v41 = vld [vmem:[#allocation7 + $0x98] sm:$0xff]   ;;  %v2668_v42 = vld [vmem:[#allocation7 + $0x60] sm:$0xff]  }
  0xd3   :  { %1386 = vmatprep.subr.bf16.mxu0 %v2594_v43  ;;  %1558 = vmatprep.subr.bf16.mxu1 %v2597_v44  ;;  %v2669_v43 = vld [vmem:[#allocation7 + $0xe0] sm:$0xff]  }
  0xd4   :  { %v2670_v44 = vld [vmem:[#allocation7 + $0x20] sm:$0xff]  }
  0xd6   :  { %1387 = vmatpush1.bf16.msra.mxu0 %v2592_v45  ;;  %1559 = vmatpush1.bf16.msra.mxu1 %v2595_v46  ;;  %v2671_v45 = vld [vmem:[#allocation7 + $0xa0] sm:$0xff]   ;;  %v2672_v46 = vld [vmem:[#allocation7 + $0x68] sm:$0xff]  }
  0xd7   :  { %1388 = vmatprep.subr.bf16.mxu0 %v2600_v47  ;;  %1560 = vmatprep.subr.bf16.mxu1 %v2603_v48  ;;  %v2673_v47 = vld [vmem:[#allocation7 + $0xe8] sm:$0xff]  }
  0xd8   :  { %v2674_v48 = vld [vmem:[#allocation7 + $0x28] sm:$0xff]  }
  0xda   :  { %1389 = vmatpush1.bf16.msra.mxu0 %v2598_v49  ;;  %1561 = vmatpush1.bf16.msra.mxu1 %v2601_v50  ;;  %v2675_v49 = vld [vmem:[#allocation7 + $0xa8] sm:$0xff]   ;;  %v2676_v50 = vld [vmem:[#allocation7 + $0x70] sm:$0xff]  }
  0xdb   :  { %1390 = vmatprep.subr.bf16.mxu0 %v2606_v51  ;;  %1562 = vmatprep.subr.bf16.mxu1 %v2609_v52  ;;  %v2677_v51 = vld [vmem:[#allocation7 + $0xf0] sm:$0xff]  }
  0xdc   :  { %v2678_v52 = vld [vmem:[#allocation7 + $0x30] sm:$0xff]  }
  0xde   :  { %1391 = vmatpush1.bf16.msra.mxu0 %v2604_v53  ;;  %1563 = vmatpush1.bf16.msra.mxu1 %v2607_v54  ;;  %v2679_v53 = vld [vmem:[#allocation7 + $0xb0] sm:$0xff]   ;;  %v2680_v54 = vld [vmem:[#allocation7 + $0x78] sm:$0xff]  }
  0xdf   :  { %1392 = vmatprep.subr.bf16.mxu0 %v2612_v55  ;;  %1564 = vmatprep.subr.bf16.mxu1 %v2615_v56  ;;  %v2681_v55 = vld [vmem:[#allocation7 + $0xf8] sm:$0xff]  }
  0xe0   :  { %v2682_v56 = vld [vmem:[#allocation7 + $0x38] sm:$0xff]  }
  0xe2   :  { %1393 = vmatpush1.bf16.msra.mxu0 %v2610_v57  ;;  %1565 = vmatpush1.bf16.msra.mxu1 %v2613_v58  ;;  %v2683_v57 = vld [vmem:[#allocation7 + $0xb8] sm:$0xff]   ;;  %v282_v58 = vlaneseq }
  0xe3   :  { %1394 = vmatprep.subr.bf16.mxu0 %v2618_v59  ;;  %1566 = vmatprep.subr.bf16.mxu1 %v2621_v60 }
  0xe4   :  { %v283_v59 = vshrl.u32 %v282_v58, 7 }
  0xe6   :  { %1395 = vmatpush1.bf16.msra.mxu0 %v2616_v61  ;;  %1567 = vmatpush1.bf16.msra.mxu1 %v2619_v62  ;;  %v284_v60 = vsub.s32 0, %v283_v59  ;;  %v292_v61 = vsub.s32 2, %v283_v59  ;;  %v280_v62 = vld [vmem:[%s2891_s2] sm:$0xf] }
  0xe7   :  { %1396 = vmatprep.subr.bf16.mxu0 %v2624_v63  ;;  %1568 = vmatprep.subr.bf16.mxu1 %v2627_v0  ;;  %v288_v63 = vsub.s32 1, %v283_v59  ;;  %v296_v0 = vsub.s32 3, %v283_v59 }
  0xea   :  { %1397 = vmatpush1.bf16.msra.mxu0 %v2622_v1  ;;  %1569 = vmatpush1.bf16.msra.mxu1 %v2625_v2  ;;  %v285_v1 = vrot.slane %v280_v62, %v284_v60  ;;  %v293_v2 = vrot.slane %v280_v62, %v292_v61 }
  0xeb   :  { %1398 = vmatprep.subr.bf16.mxu0 %v2630_v3  ;;  %1570 = vmatprep.subr.bf16.mxu1 %v2633_v4  ;;  %v289_v3 = vrot.slane %v280_v62, %v288_v63  ;;  %v297_v4 = vrot.slane %v280_v62, %v296_v0 }
  0xee   :  { %1399 = vmatpush1.bf16.msra.mxu0 %v2628_v5  ;;  %1571 = vmatpush1.bf16.msra.mxu1 %v2631_v6 }
  0xef   :  { %1400 = vmatprep.subr.bf16.mxu0 %v2636_v7  ;;  %1572 = vmatprep.subr.bf16.mxu1 %v2639_v8 }
  0xf2   :  { %1401 = vmatpush1.bf16.msra.mxu0 %v2634_v9  ;;  %1573 = vmatpush1.bf16.msra.mxu1 %v2637_v10 }
  0xf3   :  { %1402 = vmatprep.subr.bf16.mxu0 %v2642_v11  ;;  %1574 = vmatprep.subr.bf16.mxu1 %v2645_v12 }
  0xf6   :  { %1403 = vmatpush1.bf16.msra.mxu0 %v2640_v13  ;;  %1575 = vmatpush1.bf16.msra.mxu1 %v2643_v14 }
  0xf7   :  { %1415 = vmatprep.subr.bf16.mxu0 %v2648_v17  ;;  %1587 = vmatprep.subr.bf16.mxu1 %v2651_v18 }
  0xf9   :  { %1405 = vmatmul.mubr.bf16.vlgmr.msra.gmra.mrb[0].mxu0 %v81_v19  ;;  %1577 = vmatmul.mubr.bf16.vlgmr.msra.gmra.mrb[0].mxu1 %v81_v19 }
  0xfa   :  { %1416 = vmatpush1.bf16.msra.mxu0 %v2646_v20  ;;  %1588 = vmatpush1.bf16.msra.mxu1 %v2649_v21 }
  0xfb   :  { %1447 = vmatprep.mubr.bf16.mxu0 %v2795_v24  ;;  %1619 = vmatprep.mubr.bf16.mxu1 %v2795_v24 }
  0xfc   :  { %2269 = vmatprep.subr.bf16.mxu0 %v2652_v22  ;;  %2291 = vmatprep.subr.bf16.mxu1 %v2653_v23 }
 0x105   :  { %2234 = vmatmul.mubr.msk.bf16.vlgmr.msra.gmra.mrb[0].mxu0 %vm1282_vm0, %v83_v27  ;;  %2235 = vmatmul.mubr.msk.bf16.vlgmr.msra.gmra.mrb[0].mxu1 %vm1282_vm0, %v83_v27 }
 0x106   :  { %2270 = vmatpush3.bf16.msra.mxu0 %v2654_v28  ;;  %2292 = vmatpush3.bf16.msra.mxu1 %v2655_v29 }
 0x107   :  { %2271 = vmatprep.subr.bf16.mxu0 %v2656_v30  ;;  %2293 = vmatprep.subr.bf16.mxu1 %v2657_v31 }
 0x10a   :  { %2272 = vmatpush3.bf16.msra.mxu0 %v2658_v32  ;;  %2294 = vmatpush3.bf16.msra.mxu1 %v2659_v33 }
 0x10b   :  { %2273 = vmatprep.subr.bf16.mxu0 %v2660_v34  ;;  %2295 = vmatprep.subr.bf16.mxu1 %v2661_v35  ;;  %v2236_v35 = vld [vmem:[%s2893_s4] ss:$0 sm:$0xff]  ;;  %s2796_s4 = smov [#allocation8]  }
 0x10c   :  { %s2025_s10 = sshll.u32 %s2796_s4, 4  ;;  %s2026_s10 = int_to_ptr.vmem [resolvable:$true] %s2025_s10 }
 0x10d   :  { %s2758_s11 = scalar_lea.vmem %s2026_s10, 256  ;;  %p2763_p11 = scmp.lt.s32.totalorder %s2026_s10, %s2026_s10 }
 0x10e   :  { %2274 = vmatpush3.bf16.msra.mxu0 %v2662_v36  ;;  %2296 = vmatpush3.bf16.msra.mxu1 %v2663_v37  ;;  %p2759_p10 = scmp.ne.s32.totalorder %s2026_s10, %s2758_s11  ;;  %p2764_p12 = scmp.lt.s32.totalorder %s2758_s11, %s2758_s11 }
 0x10f   :  { %2275 = vmatprep.subr.bf16.mxu0 %v2664_v38  ;;  %2297 = vmatprep.subr.bf16.mxu1 %v2665_v39  ;;  %v1988_v38 = vand.u32 127, %v282_v58 }
 0x110   :  { %p2765_p13 = por %p2764_p12, %p2763_p11 }
 0x111   :  { %vm1989_vm1 = vcmp.lt.s32.totalorder %v1988_v38, 10 }
 0x112   :  { %2276 = vmatpush3.bf16.msra.mxu0 %v2666_v40  ;;  %2298 = vmatpush3.bf16.msra.mxu1 %v2667_v41  ;;  %p2766_p0 = pnand %p2765_p13, %p2759_p10 }
 0x113   :  { %2277 = vmatprep.subr.bf16.mxu0 %v2668_v42  ;;  %2299 = vmatprep.subr.bf16.mxu1 %v2669_v43 }
 0x116   :  { %2278 = vmatpush3.bf16.msra.mxu0 %v2670_v44  ;;  %2300 = vmatpush3.bf16.msra.mxu1 %v2671_v45 }
 0x117   :  { %2279 = vmatprep.subr.bf16.mxu0 %v2672_v46  ;;  %2301 = vmatprep.subr.bf16.mxu1 %v2673_v47 }
 0x11a   :  { %2280 = vmatpush3.bf16.msra.mxu0 %v2674_v48  ;;  %2302 = vmatpush3.bf16.msra.mxu1 %v2675_v49 }
 0x11b   :  { %2281 = vmatprep.subr.bf16.mxu0 %v2676_v50  ;;  %2303 = vmatprep.subr.bf16.mxu1 %v2677_v51 }
 0x11e   :  { %2282 = vmatpush3.bf16.msra.mxu0 %v2678_v52  ;;  %2304 = vmatpush3.bf16.msra.mxu1 %v2679_v53 }
 0x11f   :  { %2283 = vmatprep.subr.bf16.mxu0 %v2680_v54  ;;  %2305 = vmatprep.subr.bf16.mxu1 %v2681_v55 }
 0x122   :  { %2284 = vmatpush3.bf16.msra.mxu0 %v2682_v56  ;;  %2306 = vmatpush3.bf16.msra.mxu1 %v2683_v57 }
 0x1d8   :  { %v1449_v5 = vpop.f32.mrb[0].mxu0  ;;  %v1621_v6 = vpop.f32.mrb[0].mxu1 }
 0x1d9   :  { %v2313_v7 = vadd.f32 %v1449_v5, %v285_v1  ;;  %v2317_v8 = vadd.f32 %v1621_v6, %v293_v2  ;;  %v1451_v9 = vpop.f32.mrb[1].mxu0  ;;  %v1623_v10 = vpop.f32.mrb[1].mxu1 }
 0x1da   :  { %v2314_v11 = vadd.f32 %v1451_v9, %v289_v3  ;;  %v2318_v12 = vadd.f32 %v1623_v10, %v297_v4  ;;  %v1453_v13 = vpop.f32.mrb[2].mxu0  ;;  %v1625_v14 = vpop.f32.mrb[2].mxu1 }
 0x1db   :  { %v2315_v15 = vadd.f32 %v1453_v13, %v285_v1  ;;  %v2319_v16 = vadd.f32 %v1625_v14, %v293_v2  ;;  %v1455_v17 = vpop.f32.mrb[3].mxu0  ;;  %v1627_v18 = vpop.f32.mrb[3].mxu1  ;;  %v1630_v21 = vmax.f32 %v2313_v7, 0.0  ;;  %v1632_v22 = vmax.f32 %v2317_v8, 0.0 }
 0x1dc   :  { %v2316_v19 = vadd.f32 %v1455_v17, %v289_v3  ;;  %v2320_v20 = vadd.f32 %v1627_v18, %v297_v4  ;;  %v1631_v25 = vmax.f32 %v2314_v11, 0.0  ;;  %v1633_v26 = vmax.f32 %v2318_v12, 0.0 }
 0x1dd   :  { %v1634_v23 = vmax.f32 %v2315_v15, 0.0  ;;  %v1636_v24 = vmax.f32 %v2319_v16, 0.0 }
 0x1de   :  { %v1635_v27 = vmax.f32 %v2316_v19, 0.0  ;;  %v1637_v28 = vmax.f32 %v2320_v20, 0.0 }
 0x1df   :  { %v1638_v29 = vpack.c.bf16 %v1634_v23, %v1630_v21  ;;  %v1640_v30 = vpack.c.bf16 %v1636_v24, %v1632_v22 }
 0x1e0   :  { %v1639_v31 = vpack.c.bf16 %v1635_v27, %v1631_v25  ;;  %v1641_v32 = vpack.c.bf16 %v1637_v28, %v1633_v26 }
 0x1e2   :  { %1937 = vmatprep.mubr.bf16.mxu0 %v1639_v31  ;;  %1978 = vmatprep.mubr.bf16.mxu1 %v1641_v32 }
 0x1e3   :  { %1938 = vmatmul.mubr.bf16.vlgmr.msra.gmra.mrb[4].mxu0 %v1638_v29  ;;  %1979 = vmatmul.mubr.bf16.vlgmr.msra.gmra.mrb[4].mxu1 %v1640_v30 }
 0x2b6   :  { %v2285_v33 = vpop.f32.mrb[4].mxu0  ;;  %v2307_v34 = vpop.f32.mrb[4].mxu1 }
 0x2b7   :  { %v2286_v36 = vpop.f32.mrb[5].mxu0  ;;  %v2308_v37 = vpop.f32.mrb[5].mxu1 }
 0x2b8   :  { %v2287_v39 = vadd.f32 %v2286_v36, %v2285_v33  ;;  %v2309_v40 = vadd.f32 %v2308_v37, %v2307_v34  ;;  %v2288_v41 = vpop.f32.mrb[6].mxu0  ;;  %v2310_v42 = vpop.f32.mrb[6].mxu1 }
 0x2b9   :  { %v2289_v43 = vpop.f32.mrb[7].mxu0  ;;  %v2311_v44 = vpop.f32.mrb[7].mxu1 }
 0x2ba   :  { %v1940_v45 = vadd.f32 %v2287_v39, %v2236_v35  ;;  %v2290_v46 = vadd.f32 %v2289_v43, %v2288_v41  ;;  %v2312_v47 = vadd.f32 %v2311_v44, %v2310_v42 }
 0x2bc   :  { %v1943_v48 = vadd.f32 %v2290_v46, %v2236_v35  ;;  %v1981_v49 = vadd.f32 %v2309_v40, %v1940_v45 }
 0x2be   :  { %v1992_v50 = vsel %vm1989_vm1, %v1981_v49, -inf  ;;  %v1984_v51 = vadd.f32 %v2312_v47, %v1943_v48 }
 0x2bf   :  { %1994 = vmax.xlane.f32.xlu0 %v1992_v50 }
 0x2c0   :  { %v1993_v52 = vsel %vm1989_vm1, %v1984_v51, -inf }
 0x2c3   :  { %1996 = vmax.xlane.f32.xlu0 %v1993_v52 }
 0x34c   :  { %v1995_v53 = vpop.xlane.xlu0 %1994 }
 0x34d   :  { %v1998_v54 = vsub.f32 %v1981_v49, %v1995_v53 }
 0x34f   :  { %v2000_v55 = vmul.f32 1.442695, %v1998_v54 }
 0x350   :  { %v1997_v56 = vpop.xlane.xlu0 %1996 }
 0x351   :  { %2684 = vpow2.f32 %v2000_v55  ;;  %v1999_v57 = vsub.f32 %v1984_v51, %v1997_v56 }
 0x353   :  { %v2002_v58 = vmul.f32 1.442695, %v1999_v57 }
 0x355   :  { %2686 = vpow2.f32 %v2002_v58 }
 0x35b   :  { %v2685_v59 = vpop.eup %2684 }
 0x35c   :  { %v2004_v60 = vsel %vm1989_vm1, %v2685_v59, 0.0 }
 0x35d   :  { %2006 = vadd.xlane.f32.xlu1 %v2004_v60 }
 0x35f   :  { %v2687_v61 = vpop.eup %2686 }
 0x360   :  { %v2005_v62 = vsel %vm1989_vm1, %v2687_v61, 0.0 }
 0x361   :  { %2008 = vadd.xlane.f32.xlu1 %v2005_v62 }
 0x3ea   :  { %v2007_v63 = vpop.xlane.xlu1 %2006 }
 0x3eb   :  { %2688 = vlog2.f32 %v2007_v63 }
 0x3ee   :  { %v2009_v0 = vpop.xlane.xlu1 %2008 }
 0x3ef   :  { %2690 = vlog2.f32 %v2009_v0 }
 0x3f5   :  { %v2689_v1 = vpop.eup %2688 }
 0x3f6   :  { %v2011_v2 = vmul.f32 0.6931472, %v2689_v1 }
 0x3f8   :  { %v2014_v3 = vsub.f32 %v1998_v54, %v2011_v2 }
 0x3f9   :  { %v2691_v4 = vpop.eup %2690 }
 0x3fa   :  { %v2016_v5 = vsel %vm1989_vm1, %v2014_v3, 0.0  ;;  %v2013_v6 = vmul.f32 0.6931472, %v2691_v4 }
 0x3fb   :  { %2018 = vst [vmem:[#allocation8] sm:$0xff] %v2016_v5 }
 0x3fc   :  { %v2015_v7 = vsub.f32 %v1999_v57, %v2013_v6 }
 0x3fe   :  { %v2017_v8 = vsel %vm1989_vm1, %v2015_v7, 0.0 }
 0x3ff   :  { %2019 = vst [vmem:[#allocation8 + $0x8] sm:$0xff] %v2017_v8 }
 0x400   :  { %2769 = shalt.err (!%p2766_p0)
}
 0x401   :  { %s2770_s14 = scalar_lea.hbm %s2894_s5, 256 }
 0x402   :  { %p2771_p1 = scmp.ne.s32.totalorder %s2894_s5, %s2770_s14  ;;  %p2774_p2 = scmp.lt.u32.totalorder %s2770_s14, %s2894_s5 }
 0x404   :  { %p2776_p3 = pnand %p2774_p2, %p2771_p1 }
 0x406   :  { %2779 = shalt.err (!%p2776_p3)
}
 0x407   :  { %s2797_s18 = smov 128   ;;  %s2798_s19 = smov 8  }
 0x408   :  { %2031 = dma.vmem_to_hbm [thread:$0]  %s2026_s10, 256, %s2894_s5, [#allocation4], %s2797_s18, %s2797_s18, %s2798_s19  }
 0x409   :  { %2784 = dma.done.wait [#allocation4], 256  }
 0x40a   :  { %2785 = vsyncadd [#allocation4], 4294967040 }
 0x40b   :  { %2035 = vsyncpa [#allocation3], 1 }
 0x40c   :  { %2036 = vsyncpa [#allocation6], 1 }
 0x40d   :  { %2037 = vsyncpa [#allocation4], 1 }

</bundles_post_ra>
